<compile_context>
chip_gen: v6e
topology: v6e:2x2x1
jax: 0.10.0
libtpu: 0.0.40
codegen_flags: <defaults>
</compile_context>

<pallas_src>
import jax
import jax.numpy as jnp
from jax.experimental import pallas as pl
from jax.experimental.pallas import tpu as pltpu


def _make_transition_kernel(horizontal_tap):
    """horizontal_tap: 'mxu' -> weight duplicated over the horizontal tap (one matmul);
                       'vpu' -> horizontal tap summed on the VPU, (Cin, Cout) weight."""

    def kernel(x_ref, scale_ref, bias_ref, w_ref, o_ref):
        # x_ref  : (TR, 2, W2, 2*Cin)  -- TR row-pairs; axis 1 = vertical pool tap,
        #                                 last axis packs [even-col | odd-col] channels
        # scale  : (1, 2*Cin) f32      -- folded BN scale (tiled over horizontal taps)
        # bias   : (1, 2*Cin) f32      -- folded BN bias  (tiled over horizontal taps)
        # w_ref  : (2*Cin, Cp) or (Cin, Cp) -- conv weight with 0.25 pool norm folded
        # o_ref  : (TR, W2, Cp)
        s = scale_ref[...]                                        # (1, 2*Cin)
        b = bias_ref[...]                                         # (1, 2*Cin)

        # relu(bn(x)) on the whole block in one fused expression (VPU), then sum the
        # two vertical pool taps.
        y = jnp.maximum(x_ref[...].astype(jnp.float32) * s + b, 0.0)   # (TR,2,W2,2Cin)
        y = y[:, 0] + y[:, 1]                                           # (TR,W2,2Cin)

        tr, w2, c2 = y.shape
        if horizontal_tap == "vpu":
            cin = c2 // 2
            y = y[..., :cin] + y[..., cin:]                             # (TR,W2,Cin)

        # Merge (TR, W2) into the matmul M dim.  Done in f32 -> free view whenever
        # W2 % 8 == 0; otherwise a VMEM copy (Mosaic has no 3-D x 2-D dot_general).
        y2 = y.reshape(tr * w2, y.shape[-1]).astype(w_ref.dtype)

        # Pool + 1x1 conv as a single MXU matmul (f32 accumulation).  With the
        # duplicated weight ('mxu'), contracting over 2*Cin sums the horizontal taps.
        out = jnp.dot(y2, w_ref[...], preferred_element_type=jnp.float32)
        o_ref[...] = out.reshape(tr, w2, -1).astype(o_ref.dtype)

    return kernel


def transition_forward_nhwc(x_nhwc, gamma, beta, running_mean, running_var, conv_w,
                            eps=1e-5, matmul_dtype=jnp.bfloat16,
                            horizontal_tap="mxu", out_dtype=None,
                            target_block_bytes=4 * 1024 * 1024,
                            vmem_limit_bytes=32 * 1024 * 1024):
    """NHWC fast path: (N, H, W, Cin) -> (N, H//2, W//2, Cout). No HBM layout passes.

    For v5e + bf16 activations (MXU-limited) pass horizontal_tap="vpu"; on v6e/v5e
    target_block_bytes can be raised to 8-16 MiB with a matching vmem_limit_bytes.
    """
    N, H, W, Cin = x_nhwc.shape
    Cout = conv_w.shape[0]
    H2, W2 = H // 2, W // 2
    if (H % 2) or (W % 2):
        # Match F.avg_pool2d(·, 2): silently drop the odd trailing row/col.
        x_nhwc = x_nhwc[:, :2 * H2, :2 * W2, :]
    rows = N * H2                       # independent row-pairs
    m_out = rows * W2                   # pooled output pixels
    out_dtype = x_nhwc.dtype if out_dtype is None else out_dtype

    # Fold BN (inference mode) into per-channel scale/bias (f32), tiled x2 to match
    # the [even-col | odd-col] channel packing of the kernel's last axis.
    scale = (gamma.astype(jnp.float32) /
             jnp.sqrt(running_var.astype(jnp.float32) + eps))            # (Cin,)
    bias = beta.astype(jnp.float32) - running_mean.astype(jnp.float32) * scale
    scale2 = jnp.tile(scale, 2).reshape(1, 2 * Cin)
    bias2 = jnp.tile(bias, 2).reshape(1, 2 * Cin)

    # Conv weight with the 0.25 avg-pool normalization folded in.
    w = conv_w.reshape(Cout, Cin).T.astype(jnp.float32) * 0.25           # (Cin, Cout)
    if horizontal_tap == "mxu":
        w_mat = jnp.concatenate([w, w], axis=0)                          # (2*Cin, Cout)
    else:
        w_mat = w                                                        # (Cin, Cout)

    # Lane-dense output stores: pad Cout to a multiple of 128 only when the padding
    # overhead is modest (real DenseNet transitions already have Cout % 128 == 0).
    cout_pad = -(-Cout // 128) * 128
    pad_out = (Cout % 128 != 0) and (cout_pad <= 2 * Cout)
    if pad_out:
        w_mat = jnp.pad(w_mat, ((0, 0), (0, cout_pad - Cout)))
    else:
        cout_pad = Cout
    w_mat = w_mat.astype(matmul_dtype)
    kdim = w_mat.shape[0]

    # Free view of NHWC (pure reshape, no data movement): (N*H2, 2, W2, 2*Cin).
    x_view = x_nhwc.reshape(rows, 2, W2, 2 * Cin)

    # Tile the row-pair axis: ~target_block_bytes per x block, cdiv grid (masked
    # tail), blocks re-balanced, and >= 2 grid steps whenever possible so the
    # pipeline overlaps DMA/compute and the grid shards across TensorCores.
    row_bytes = 2 * W2 * 2 * Cin * x_view.dtype.itemsize
    tr = max(1, min(rows, target_block_bytes // max(row_bytes, 1)))
    if tr >= rows and rows >= 2:
        tr = pl.cdiv(rows, 2)
    nblocks = pl.cdiv(rows, tr)
    tr = pl.cdiv(rows, nblocks)          # balance block sizes across the grid
    nblocks = pl.cdiv(rows, tr)

    cost = pl.CostEstimate(
        flops=int(2 * m_out * kdim * cout_pad),
        transcendentals=0,
        bytes_accessed=int(x_view.size * x_view.dtype.itemsize
                           + w_mat.size * w_mat.dtype.itemsize
                           + (scale2.size + bias2.size) * 4
                           + m_out * cout_pad * jnp.dtype(out_dtype).itemsize),
    )

    out3 = pl.pallas_call(
        _make_transition_kernel(horizontal_tap),
        out_shape=jax.ShapeDtypeStruct((rows, W2, cout_pad), out_dtype),
        grid_spec=pltpu.PrefetchScalarGridSpec(
            num_scalar_prefetch=0,
            grid=(nblocks,),
            in_specs=[
                pl.BlockSpec((tr, 2, W2, 2 * Cin), lambda t: (t, 0, 0, 0)),
                pl.BlockSpec((1, 2 * Cin), lambda t: (0, 0)),       # resident
                pl.BlockSpec((1, 2 * Cin), lambda t: (0, 0)),       # resident
                pl.BlockSpec((kdim, cout_pad), lambda t: (0, 0)),   # resident
            ],
            out_specs=pl.BlockSpec((tr, W2, cout_pad), lambda t: (t, 0, 0)),
        ),
        compiler_params=pltpu.CompilerParams(
            dimension_semantics=("parallel",),
            vmem_limit_bytes=vmem_limit_bytes,
        ),
        cost_estimate=cost,
    )(x_view, scale2, bias2, w_mat)

    if pad_out:
        out3 = out3[..., :Cout]
    return out3.reshape(N, H2, W2, Cout)


def transition_forward(x_nchw, gamma, beta, running_mean, running_var, conv_w,
                       eps=1e-5, matmul_dtype=jnp.bfloat16, horizontal_tap="mxu"):
    """NCHW adapter matching the PyTorch module. The transposes here are test glue;
    a real TPU pipeline should feed NHWC (ideally bf16) into transition_forward_nhwc."""
    x_nhwc = jnp.transpose(x_nchw, (0, 2, 3, 1))
    out_nhwc = transition_forward_nhwc(x_nhwc, gamma, beta, running_mean, running_var,
                                       conv_w, eps=eps, matmul_dtype=matmul_dtype,
                                       horizontal_tap=horizontal_tap)
    return jnp.transpose(out_nhwc, (0, 3, 1, 2))


def _reference(x_nchw, gamma, beta, running_mean, running_var, conv_w, eps=1e-5):
    """Pure-JAX reference matching the PyTorch module (eval-mode BN), all f32."""
    scale = gamma / jnp.sqrt(running_var + eps)
    bias = beta - running_mean * scale
    y = x_nchw * scale[None, :, None, None] + bias[None, :, None, None]
    y = jnp.maximum(y, 0.0)
    z = jnp.einsum("nchw,oc->nohw", y, conv_w.reshape(conv_w.shape[0], conv_w.shape[1]))
    N, Co, H, W = z.shape
    return z.reshape(N, Co, H // 2, 2, W // 2, 2).mean(axis=(3, 5))


if __name__ == "__main__":
    key = jax.random.PRNGKey(0)
    k_x, k_g, k_b, k_m, k_v, k_w = jax.random.split(key, 6)

    N, Cin, H, W = 2, 4, 16, 16
    Cout = Cin // 2  # DenseNet transition halves channels

    x = jax.random.normal(k_x, (N, Cin, H, W), dtype=jnp.float32)
    gamma = jax.random.uniform(k_g, (Cin,), minval=0.5, maxval=1.5, dtype=jnp.float32)
    beta = 0.1 * jax.random.normal(k_b, (Cin,), dtype=jnp.float32)
    running_mean = 0.1 * jax.random.normal(k_m, (Cin,), dtype=jnp.float32)
    running_var = jax.random.uniform(k_v, (Cin,), minval=0.5, maxval=1.5, dtype=jnp.float32)
    conv_w = jax.random.normal(k_w, (Cout, Cin, 1, 1), dtype=jnp.float32) / jnp.sqrt(Cin)

    ref = _reference(x, gamma, beta, running_mean, running_var, conv_w)

    # 1) Default NCHW path (bf16 matmul operands, f32 accumulation) — loose tolerance.
    out = transition_forward(x, gamma, beta, running_mean, running_var, conv_w)
    out = jax.block_until_ready(out)
    assert out.shape == (N, Cout, H // 2, W // 2), out.shape
    assert jnp.allclose(out, ref, atol=5e-2, rtol=5e-2), float(jnp.max(jnp.abs(out - ref)))

    # 2) Full-f32 matmul path — tight check of the kernel math (MXU horizontal tap).
    out_f32 = transition_forward(x, gamma, beta, running_mean, running_var, conv_w,
                                 matmul_dtype=jnp.float32)
    out_f32 = jax.block_until_ready(out_f32)
    assert jnp.allclose(out_f32, ref, atol=1e-5, rtol=1e-5), \
        float(jnp.max(jnp.abs(out_f32 - ref)))

    # 3) Full-f32, VPU horizontal-tap path (v5e variant) — tight check.
    out_vpu = transition_forward(x, gamma, beta, running_mean, running_var, conv_w,
                                 matmul_dtype=jnp.float32, horizontal_tap="vpu")
    out_vpu = jax.block_until_ready(out_vpu)
    assert jnp.allclose(out_vpu, ref, atol=1e-5, rtol=1e-5), \
        float(jnp.max(jnp.abs(out_vpu - ref)))

    # 4) bf16 end-to-end NHWC fast path (activations and output in bf16, as produced
    #    by an upstream bf16 layer) — loose tolerance vs. the f32 reference.
    x_nhwc_bf16 = jnp.transpose(x, (0, 2, 3, 1)).astype(jnp.bfloat16)
    out_bf16 = transition_forward_nhwc(x_nhwc_bf16, gamma, beta, running_mean,
                                       running_var, conv_w)
    out_bf16 = jax.block_until_ready(out_bf16)
    assert out_bf16.dtype == jnp.bfloat16
    assert out_bf16.shape == (N, H // 2, W // 2, Cout), out_bf16.shape
    ref_nhwc = jnp.transpose(ref, (0, 2, 3, 1))
    assert jnp.allclose(out_bf16.astype(jnp.float32), ref_nhwc, atol=1e-1, rtol=1e-1), \
        float(jnp.max(jnp.abs(out_bf16.astype(jnp.float32) - ref_nhwc)))

    print("KERNEL_OK")
</pallas_src>

<mosaic_0001>
module attributes {stable_mosaic.version = 11 : i64} {
  func.func @kernel(%arg0: i32, %arg1: memref<8x2x8x8xf32, #tpu.memory_space<vmem>>, %arg2: memref<1x8xf32, #tpu.memory_space<vmem>>, %arg3: memref<1x8xf32, #tpu.memory_space<vmem>>, %arg4: memref<8x2xbf16, #tpu.memory_space<vmem>>, %arg5: memref<8x8x2xf32, #tpu.memory_space<vmem>>) attributes {dimension_semantics = [#tpu.dimension_semantics<parallel>], iteration_bounds = array<i64: 2>, scalar_prefetch = 0 : i64, scratch_operands = 0 : i64, tpu.core_type = #tpu.core_type<tc>, window_params = [{transform_indices = @transform_0, window_bounds = array<i64: 8, 2, 8, 8>}, {pipeline_mode = #tpu.pipeline_mode<synchronous>, transform_indices = @transform_1, window_bounds = array<i64: 1, 8>}, {pipeline_mode = #tpu.pipeline_mode<synchronous>, transform_indices = @transform_2, window_bounds = array<i64: 1, 8>}, {pipeline_mode = #tpu.pipeline_mode<synchronous>, transform_indices = @transform_3, window_bounds = array<i64: 8, 2>}, {transform_indices = @transform_4, window_bounds = array<i64: 8, 8, 2>}]} {
    %c0 = arith.constant 0 : index
    %c0_0 = arith.constant 0 : index
    %0 = vector.load %arg2[%c0, %c0_0] : memref<1x8xf32, #tpu.memory_space<vmem>>, vector<1x8xf32>
    %c0_1 = arith.constant 0 : index
    %c0_2 = arith.constant 0 : index
    %1 = vector.load %arg3[%c0_1, %c0_2] : memref<1x8xf32, #tpu.memory_space<vmem>>, vector<1x8xf32>
    %c0_3 = arith.constant 0 : index
    %c0_4 = arith.constant 0 : index
    %c0_5 = arith.constant 0 : index
    %c0_6 = arith.constant 0 : index
    %2 = vector.load %arg1[%c0_3, %c0_4, %c0_5, %c0_6] : memref<8x2x8x8xf32, #tpu.memory_space<vmem>>, vector<8x2x8x8xf32>
    %3 = vector.shape_cast %0 : vector<1x8xf32> to vector<1x1x1x8xf32>
    %4 = vector.broadcast %3 : vector<1x1x1x8xf32> to vector<8x2x8x8xf32>
    %5 = arith.mulf %2, %4 : vector<8x2x8x8xf32>
    %6 = vector.shape_cast %1 : vector<1x8xf32> to vector<1x1x1x8xf32>
    %7 = vector.broadcast %6 : vector<1x1x1x8xf32> to vector<8x2x8x8xf32>
    %8 = arith.addf %5, %7 : vector<8x2x8x8xf32>
    %cst = arith.constant 0.000000e+00 : f32
    %9 = vector.broadcast %cst : f32 to vector<8x2x8x8xf32>
    %10 = arith.maximumf %8, %9 : vector<8x2x8x8xf32>
    %11 = vector.extract_strided_slice %10 {offsets = [0, 0, 0, 0], sizes = [8, 1, 8, 8], strides = [1, 1, 1, 1]} : vector<8x2x8x8xf32> to vector<8x1x8x8xf32>
    %12 = vector.shape_cast %11 : vector<8x1x8x8xf32> to vector<8x8x8xf32>
    %13 = vector.extract_strided_slice %10 {offsets = [0, 1, 0, 0], sizes = [8, 1, 8, 8], strides = [1, 1, 1, 1]} : vector<8x2x8x8xf32> to vector<8x1x8x8xf32>
    %14 = vector.shape_cast %13 : vector<8x1x8x8xf32> to vector<8x8x8xf32>
    %15 = arith.addf %12, %14 : vector<8x8x8xf32>
    %16 = vector.shape_cast %15 : vector<8x8x8xf32> to vector<64x8xf32>
    %17 = arith.truncf %16 : vector<64x8xf32> to vector<64x8xbf16>
    %c0_7 = arith.constant 0 : index
    %c0_8 = arith.constant 0 : index
    %18 = vector.load %arg4[%c0_7, %c0_8] : memref<8x2xbf16, #tpu.memory_space<vmem>>, vector<8x2xbf16>
    %cst_9 = arith.constant dense<0.000000e+00> : vector<64x2xf32>
    %19 = tpu.matmul %17, %18, %cst_9 {dimension_numbers = #tpu.dot_dimension_numbers<[1], [0], [0], [1], [0, 0, 1, 1], [], []>} : vector<64x8xbf16>, vector<8x2xbf16>, vector<64x2xf32> -> vector<64x2xf32>
    %20 = vector.shape_cast %19 : vector<64x2xf32> to vector<8x8x2xf32>
    %c0_10 = arith.constant 0 : index
    %c0_11 = arith.constant 0 : index
    %c0_12 = arith.constant 0 : index
    %21 = vector.load %arg5[%c0_10, %c0_11, %c0_12] : memref<8x8x2xf32, #tpu.memory_space<vmem>>, vector<8x8x2xf32>
    tpu.vector_store %arg5[%c0_10, %c0_11, %c0_12], %20 {strides = array<i32>} : memref<8x8x2xf32, #tpu.memory_space<vmem>>, vector<8x8x2xf32>,
    return
  }
  func.func @transform_0(%arg0: i32) -> (i32, i32, i32, i32) {
    %c0_i32 = arith.constant 0 : i32
    %c0_i32_0 = arith.constant 0 : i32
    %c0_i32_1 = arith.constant 0 : i32
    %c0_i32_2 = arith.constant 0 : i32
    return %arg0, %c0_i32, %c0_i32_0, %c0_i32_1 : i32, i32, i32, i32
  }
  func.func @transform_1(%arg0: i32) -> (i32, i32) {
    %c0_i32 = arith.constant 0 : i32
    %c0_i32_0 = arith.constant 0 : i32
    %c0_i32_1 = arith.constant 0 : i32
    return %c0_i32, %c0_i32_0 : i32, i32
  }
  func.func @transform_2(%arg0: i32) -> (i32, i32) {
    %c0_i32 = arith.constant 0 : i32
    %c0_i32_0 = arith.constant 0 : i32
    %c0_i32_1 = arith.constant 0 : i32
    return %c0_i32, %c0_i32_0 : i32, i32
  }
  func.func @transform_3(%arg0: i32) -> (i32, i32) {
    %c0_i32 = arith.constant 0 : i32
    %c0_i32_0 = arith.constant 0 : i32
    %c0_i32_1 = arith.constant 0 : i32
    return %c0_i32, %c0_i32_0 : i32, i32
  }
  func.func @transform_4(%arg0: i32) -> (i32, i32, i32) {
    %c0_i32 = arith.constant 0 : i32
    %c0_i32_0 = arith.constant 0 : i32
    %c0_i32_1 = arith.constant 0 : i32
    return %arg0, %c0_i32, %c0_i32_0 : i32, i32, i32
  }
}

</mosaic_0001>

<bundles_post_ra>
// kernel: tpu_custom_call.1
= control target key start
LH: loop header
LB: loop body
LE: loop exit
PB: predicated region body
PF: predicated region fallthrough
CT: control target
= control target key end

     0   :  { %s522_s15 = smov 0   ;;  %s618_s0 = inlined_call_operand.vmem [shape: f32[16,2,8,8], index: 0, kind: input, shape index: {}]   ;;  %s619_s1 = inlined_call_operand.vmem [shape: f32[1,8], index: 1, kind: input, shape index: {}]   ;;  %s620_s2 = inlined_call_operand.vmem [shape: f32[1,8], index: 2, kind: input, shape index: {}]   ;;  %s621_s3 = inlined_call_operand.vmem [shape: bf16[8,2], index: 3, kind: input, shape index: {}]   ;;  %s622_s4 = inlined_call_operand.vmem [shape: f32[16,8,2], index: 4, kind: output, shape index: {}]  }
   0x1 LB: > { %s443_s16 = sadd.s32 4294967295, %s495_s15   ;;  %p447_p0 = scmp.ge.s32.totalorder %s495_s15, 1  ;;  %s495_s15 = sphi %s522_s15, %s14_s15  }
   0x2   : > { %p164_p1 = scmp.lt.s32.totalorder %s495_s15, 3 }
   0x4   : > { %p165_p2 = pnand %p447_p0, %p164_p1 }
   0x5   : > { %s448_s19 = sshll.u32 (!%p165_p2), %s443_s16, 3 }
   0x6   : > { %168 = sbr.rel (%p165_p2) target bundleno = 236 (0xec), region = 36  ;;  %p192_p3 = scmp.lt.s32.totalorder (!%p165_p2), %s448_s19, 15 }
   0xb   : > { %v295_v0 = vld [vmem:[%s621_s3] sm:$0xf]  ;;  %vm309_vm0 = vcmask 1043456   ;;  %s624_s19 = smov (!%p192_p3, %s448_s19), 15  ;;  %vm296_vm1 = vcmask 64512   ;;  %vm378_vm2 = vcmask 15360  }
   0xc   : > { %479 = vmatprep.subr.msk.bf16.mxu0 %vm309_vm0, %v295_v0  ;;  %480 = vmatprep.subr.msk.bf16.mxu1 %vm309_vm0, %v295_v0  ;;  %v311_v1 = vsel %vm309_vm0, %v295_v0, 0  ;;  %s461_s20 = sshll.u32 %s624_s19, 4  ;;  %v539_v2 = vld [vmem:[%s619_s1] ss:$0 sm:$0xff]  ;;  %s452_s28 = sshll.u32 %s624_s19, 3 }
   0xd   : > { %468 = vmatpush3.bf16.msra.mxu0 %v311_v1  ;;  %478 = vmatpush3.bf16.msra.mxu1 %v311_v1  ;;  %s544_s25 = scalar_lea.vmem %s618_s0, %s461_s20  ;;  %v549_v3 = vld [vmem:[%s620_s2] ss:$0 sm:$0xff]  ;;  %s202_s5 = scalar_lea.vmem %s622_s4, %s452_s28 }
   0xe   : > { %v207_v4 = vld [vmem:[%s544_s25] sm:$0xff]  ;;  %v208_v5 = vld [vmem:[%s544_s25 + $0x8] sm:$0xff]  ;;  %v209_v6 = vld [vmem:[%s544_s25 + $0x10] sm:$0xff] }
   0xf   : > { %v210_v7 = vld [vmem:[%s544_s25 + $0x18] sm:$0xff]  ;;  %v229_v8 = vmul.f32 %v539_v2, %v207_v4  ;;  %v230_v9 = vmul.f32 %v539_v2, %v208_v5  ;;  %v231_v10 = vmul.f32 %v539_v2, %v209_v6  ;;  %v215_v11 = vld [vmem:[%s544_s25 + $0x40] sm:$0xff]  ;;  %v216_v12 = vld [vmem:[%s544_s25 + $0x48] sm:$0xff] }
  0x10   : > { %v232_v13 = vmul.f32 %v539_v2, %v210_v7  ;;  %v217_v14 = vld [vmem:[%s544_s25 + $0x50] sm:$0xff]  ;;  %v218_v15 = vld [vmem:[%s544_s25 + $0x58] sm:$0xff]  ;;  %v237_v16 = vmul.f32 %v539_v2, %v215_v11  ;;  %v238_v17 = vmul.f32 %v539_v2, %v216_v12  ;;  %v211_v26 = vld [vmem:[%s544_s25 + $0x20] sm:$0xff] }
  0x11   : > { %v251_v18 = vadd.f32 %v549_v3, %v229_v8  ;;  %v252_v19 = vadd.f32 %v549_v3, %v230_v9  ;;  %v253_v20 = vadd.f32 %v549_v3, %v231_v10  ;;  %v239_v21 = vmul.f32 %v539_v2, %v217_v14  ;;  %v212_v27 = vld [vmem:[%s544_s25 + $0x28] sm:$0xff]  ;;  %v213_v32 = vld [vmem:[%s544_s25 + $0x30] sm:$0xff]  ;;  %v214_v37 = vld [vmem:[%s544_s25 + $0x38] sm:$0xff] }
  0x12   : > { %v254_v22 = vadd.f32 %v549_v3, %v232_v13  ;;  %v240_v23 = vmul.f32 %v539_v2, %v218_v15  ;;  %v259_v24 = vadd.f32 %v549_v3, %v237_v16  ;;  %v260_v25 = vadd.f32 %v549_v3, %v238_v17  ;;  %v219_v38 = vld [vmem:[%s544_s25 + $0x60] sm:$0xff]  ;;  %v220_v43 = vld [vmem:[%s544_s25 + $0x68] sm:$0xff]  ;;  %v221_v48 = vld [vmem:[%s544_s25 + $0x70] sm:$0xff] }
  0x13   : > { %v267_v28 = vmax.f32 %v251_v18, 0.0  ;;  %v268_v29 = vmax.f32 %v252_v19, 0.0  ;;  %v269_v30 = vmax.f32 %v253_v20, 0.0  ;;  %v261_v31 = vadd.f32 %v549_v3, %v239_v21  ;;  %v222_v52 = vld [vmem:[%s544_s25 + $0x78] sm:$0xff] }
  0x14   : > { %v270_v33 = vmax.f32 %v254_v22, 0.0  ;;  %v262_v34 = vadd.f32 %v549_v3, %v240_v23  ;;  %v275_v35 = vmax.f32 %v259_v24, 0.0  ;;  %v276_v36 = vmax.f32 %v260_v25, 0.0 }
  0x15   : > { %v283_v39 = vadd.f32 %v268_v29, %v267_v28  ;;  %v277_v40 = vmax.f32 %v261_v31, 0.0  ;;  %v233_v41 = vmul.f32 %v539_v2, %v211_v26  ;;  %v234_v42 = vmul.f32 %v539_v2, %v212_v27 }
  0x16   : > { %v284_v44 = vadd.f32 %v270_v33, %v269_v30  ;;  %v278_v45 = vmax.f32 %v262_v34, 0.0  ;;  %v287_v46 = vadd.f32 %v276_v36, %v275_v35  ;;  %v235_v47 = vmul.f32 %v539_v2, %v213_v32 }
  0x17   : > { %v236_v49 = vmul.f32 %v539_v2, %v214_v37  ;;  %v255_v50 = vadd.f32 %v549_v3, %v233_v41  ;;  %v256_v51 = vadd.f32 %v549_v3, %v234_v42  ;;  %v241_v53 = vmul.f32 %v539_v2, %v219_v38 }
  0x18   : > { %v291_v54 = vpack.c.bf16 %v284_v44, %v283_v39  ;;  %v288_v55 = vadd.f32 %v278_v45, %v277_v40  ;;  %v257_v56 = vadd.f32 %v549_v3, %v235_v47  ;;  %v242_v57 = vmul.f32 %v539_v2, %v220_v43 }
  0x19   : > { %v258_v58 = vadd.f32 %v549_v3, %v236_v49  ;;  %v271_v59 = vmax.f32 %v255_v50, 0.0  ;;  %v272_v60 = vmax.f32 %v256_v51, 0.0  ;;  %v243_v61 = vmul.f32 %v539_v2, %v221_v48 }
  0x1a   : > { %469 = vmatprep.mubr.msk.bf16.mxu0 %vm296_vm1, %v291_v54  ;;  %v293_v62 = vpack.c.bf16 %v288_v55, %v287_v46  ;;  %v273_v63 = vmax.f32 %v257_v56, 0.0  ;;  %v244_v0 = vmul.f32 %v539_v2, %v222_v52  ;;  %v263_v1 = vadd.f32 %v549_v3, %v241_v53 }
  0x1b   : > { %v274_v4 = vmax.f32 %v258_v58, 0.0  ;;  %v285_v5 = vadd.f32 %v272_v60, %v271_v59  ;;  %v264_v6 = vadd.f32 %v549_v3, %v242_v57  ;;  %v265_v7 = vadd.f32 %v549_v3, %v243_v61 }
  0x1c   : > { %473 = vmatprep.mubr.msk.bf16.mxu1 %vm296_vm1, %v293_v62  ;;  %v266_v8 = vadd.f32 %v549_v3, %v244_v0  ;;  %v279_v9 = vmax.f32 %v263_v1, 0.0 }
  0x1d   : > { %v286_v10 = vadd.f32 %v274_v4, %v273_v63  ;;  %v280_v11 = vmax.f32 %v264_v6, 0.0  ;;  %v281_v12 = vmax.f32 %v265_v7, 0.0 }
  0x1e   : > { %v282_v13 = vmax.f32 %v266_v8, 0.0 }
  0x1f   : > { %v292_v14 = vpack.c.bf16 %v286_v10, %v285_v5  ;;  %v289_v2 = vadd.f32 %v280_v11, %v279_v9 }
  0x20   : > { %v290_v15 = vadd.f32 %v282_v13, %v281_v12 }
  0x21   : > { %470 = vmatmul.mubr.msk.bf16.vlgmr.msra.gmra.mxu0 %vm296_vm1, %v292_v14 }
  0x22   : > { %v294_v16 = vpack.c.bf16 %v290_v15, %v289_v2 }
  0x24   : > { %474 = vmatmul.mubr.msk.bf16.vlgmr.msra.gmra.mxu1 %vm296_vm1, %v294_v16 }
  0xe1   : > { %v471_v3 = vpop.f32.mrf.mxu0 }
  0xe2   : > { %381 = vst.msk [vmem:[%s202_s5 + $0x10] sm:$0xff] %vm378_vm2, %v471_v3 }
  0xe3   : > { %v347_v17 = vpop.f32.mrf.mxu0 }
  0xe4   : > { %v475_v18 = vpop.f32.mrf.mxu1  ;;  %379 = vst.msk [vmem:[%s202_s5] sm:$0xff] %vm378_vm2, %v347_v17 }
  0xe5   : > { %385 = vst.msk [vmem:[%s202_s5 + $0x30] sm:$0xff] %vm378_vm2, %v475_v18  ;;  %v472_v19 = vpop.f32.mrf.mxu0 }
  0xe6   : > { %v363_v20 = vpop.f32.mrf.mxu1  ;;  %382 = vst.msk [vmem:[%s202_s5 + $0x18] sm:$0xff] %vm378_vm2, %v472_v19 }
  0xe7   : > { %383 = vst.msk [vmem:[%s202_s5 + $0x20] sm:$0xff] %vm378_vm2, %v363_v20  ;;  %v350_v21 = vpop.f32.mrf.mxu0 }
  0xe8   : > { %v476_v22 = vpop.f32.mrf.mxu1  ;;  %380 = vst.msk [vmem:[%s202_s5 + $0x8] sm:$0xff] %vm378_vm2, %v350_v21 }
  0xe9   : > { %386 = vst.msk [vmem:[%s202_s5 + $0x38] sm:$0xff] %vm378_vm2, %v476_v22 }
  0xea   : > { %v366_v23 = vpop.f32.mrf.mxu1 }
  0xeb   : > { %384 = vst.msk [vmem:[%s202_s5 + $0x28] sm:$0xff] %vm378_vm2, %v366_v23 }
  0xec PF: > { %s14_s15 = sadd.s32 1, %s495_s15  }
  0xed   : > { %p11_p4 = scmp.ge.s32.totalorder %s14_s15, 4  }
  0xef   :  { %13 = sbr.rel (!%p11_p4) target bundleno = 1 (0x1), region = 66 }

</bundles_post_ra>
